<compile_context>
chip_gen: v7x
topology: tpu7x:2x2x1
jax: 0.10.0
libtpu: 0.0.40
codegen_flags: <defaults>
</compile_context>

<pallas_src>
import functools

import numpy as np

import jax
import jax.numpy as jnp
from jax.experimental import pallas as pl
from jax.experimental.pallas import tpu as pltpu


def bert_embeddings_kernel(ids_ref,       # SMEM  (N,)        int32  (scalar prefetch)
                           tt_ref,        # VMEM  (tile_n, 1)  int32  token-type ids
                           pos_ref,       # VMEM  (tile_n, H)  f32    position-table slice
                           type_ref,      # VMEM  (Vt, H)      f32    token-type table
                           gb_ref,        # VMEM  (2, H)       f32    [gamma; beta]
                           wemb_hbm,      # HBM   (V, H)       f32    word table (pl.ANY)
                           out_ref,       # VMEM  (tile_n, H)  f32
                           gather_buf,    # VMEM  (tile_n, H)  f32    scratch
                           sem,           # DMA semaphore ()
                           *, eps):
    tile_n, H = out_ref.shape
    base = pl.program_id(0) * tile_n

    # 1) Kick off the word-embedding row gathers (exact, DMA-driven, no one-hot matmul).
    @pl.loop(0, tile_n)
    def _issue(r):
        row = ids_ref[base + r]
        pltpu.make_async_copy(wemb_hbm.at[pl.ds(row, 1)],
                              gather_buf.at[pl.ds(r, 1)],
                              sem).start()

    # 2) Overlap with the DMAs: position slice (free) + token-type select (VPU only).
    tt = tt_ref[...]                                   # (tile_n, 1) int32
    vt = type_ref.shape[0]
    tte = jnp.broadcast_to(type_ref[0:1, :], (tile_n, H))
    for t in range(1, vt):                             # tiny static loop (vt == 2 for BERT)
        tte = jnp.where(tt == t, type_ref[t:t + 1, :], tte)
    rest = pos_ref[...] + tte

    # 3) Drain all word-row DMAs (one wait per row keeps the semaphore balanced regardless
    #    of whether DMA sems count completions or bytes), then sum.
    @pl.loop(0, tile_n)
    def _drain(r):
        pltpu.make_async_copy(wemb_hbm.at[pl.ds(0, 1)],
                              gather_buf.at[pl.ds(r, 1)],
                              sem).wait()

    x = gather_buf[...] + rest

    # 4) LayerNorm over hidden: single pass (sum + sumsq), rsqrt on the EUP.
    s1 = jnp.sum(x, axis=-1, keepdims=True)
    s2 = jnp.sum(x * x, axis=-1, keepdims=True)
    inv_h = 1.0 / H
    mean = s1 * inv_h
    var = s2 * inv_h - mean * mean
    y = (x - mean) * jax.lax.rsqrt(var + eps)
    out_ref[...] = (y * gb_ref[0:1, :] + gb_ref[1:2, :]).astype(out_ref.dtype)
    # Dropout: identity in eval mode (hidden_dropout_prob only active in training).


def bert_embeddings(input_ids, token_type_ids=None, position_ids=None, params=None,
                    *, eps=1e-12, max_tile=256):
    """Forward pass of BertEmbeddings (default is_hierarchical=False path, eval mode)."""
    B, S = input_ids.shape
    V, H = params["word"].shape
    P = params["pos"].shape[0]
    T = params["type"].shape[0]
    assert P >= S, "max_position_embeddings must cover the sequence length"

    if token_type_ids is None:
        token_type_ids = jnp.zeros((B, S), jnp.int32)
    if position_ids is not None:
        expect = np.broadcast_to(np.arange(S, dtype=np.int64)[None, :], (B, S))
        if not np.array_equal(np.asarray(position_ids), expect):
            # TODO(synk): custom position_ids / is_hierarchical positions not supported.
            raise NotImplementedError("only the default arange position_ids path is supported")

    # Large tile that divides the sequence length so the position lookup is a pure slice
    # and tiles never straddle sequence boundaries.
    tile_n = min(max_tile, S)
    while S % tile_n:
        tile_n -= 1
    N = B * S
    assert tile_n % 8 == 0 or tile_n == N, "tile_n must respect the (8,128) tiling"
    blocks_per_seq = S // tile_n
    grid = (N // tile_n,)

    ids_flat = input_ids.reshape(N).astype(jnp.int32)          # scalar-prefetch (SMEM)
    tt2d = token_type_ids.reshape(N, 1).astype(jnp.int32)
    gamma_beta = jnp.stack(
        [params["gamma"].astype(jnp.float32), params["beta"].astype(jnp.float32)])  # (2, H)

    cost = pl.CostEstimate(
        flops=10 * N * H,                 # adds + LN elementwise
        transcendentals=N,                # one rsqrt per token row
        bytes_accessed=2 * N * H * 4 + N * 8 + (S + T + 2) * H * 4,
    )

    out = pl.pallas_call(
        functools.partial(bert_embeddings_kernel, eps=eps),
        out_shape=jax.ShapeDtypeStruct((N, H), jnp.float32),
        grid_spec=pltpu.PrefetchScalarGridSpec(
            num_scalar_prefetch=1,
            grid=grid,
            in_specs=[
                pl.BlockSpec((tile_n, 1), lambda i, ids: (i, 0)),                   # token-type ids
                pl.BlockSpec((tile_n, H), lambda i, ids: (i % blocks_per_seq, 0)),  # pos-table slice
                pl.BlockSpec((T, H), lambda i, ids: (0, 0)),                        # type table
                pl.BlockSpec((2, H), lambda i, ids: (0, 0)),                        # gamma/beta
                pl.BlockSpec(memory_space=pl.ANY),                                  # word table (HBM)
            ],
            out_specs=pl.BlockSpec((tile_n, H), lambda i, ids: (i, 0)),
            scratch_shapes=[
                pltpu.VMEM((tile_n, H), jnp.float32),   # gathered word rows
                pltpu.SemaphoreType.DMA(()),            # gather completion sem
            ],
        ),
        compiler_params=pltpu.CompilerParams(dimension_semantics=("parallel",)),
        cost_estimate=cost,
    )(ids_flat, tt2d,
      params["pos"].astype(jnp.float32),
      params["type"].astype(jnp.float32),
      gamma_beta,
      params["word"].astype(jnp.float32))

    return out.reshape(B, S, H)


def reference(input_ids, token_type_ids, params, eps=1e-12):
    B, S = input_ids.shape
    pos_ids = jnp.arange(S)
    x = (params["word"][input_ids]
         + params["pos"][pos_ids][None, :, :]
         + params["type"][token_type_ids])
    mean = x.mean(-1, keepdims=True)
    var = ((x - mean) ** 2).mean(-1, keepdims=True)
    return (x - mean) / jnp.sqrt(var + eps) * params["gamma"] + params["beta"]


if __name__ == "__main__":
    # Small synthetic BERT config (kept modest but large enough that the tiling is real:
    # tile_n = 128, grid = 4).
    vocab_size = 512
    max_position_embeddings = 128
    type_vocab_size = 2
    hidden_size = 128
    layer_norm_eps = 1e-12
    batch, seq = 4, 128

    key = jax.random.PRNGKey(0)
    k_w, k_p, k_t, k_g, k_b, k_ids, k_tt = jax.random.split(key, 7)

    word = 0.02 * jax.random.normal(k_w, (vocab_size, hidden_size), jnp.float32)
    word = word.at[0].set(0.0)  # padding_idx=0 row is zero at init
    pos = 0.02 * jax.random.normal(k_p, (max_position_embeddings, hidden_size), jnp.float32)
    typ = 0.02 * jax.random.normal(k_t, (type_vocab_size, hidden_size), jnp.float32)
    gamma = 1.0 + 0.01 * jax.random.normal(k_g, (hidden_size,), jnp.float32)
    beta = 0.01 * jax.random.normal(k_b, (hidden_size,), jnp.float32)
    params = {"word": word, "pos": pos, "type": typ, "gamma": gamma, "beta": beta}

    input_ids = jax.random.randint(k_ids, (batch, seq), 1, vocab_size, jnp.int32)
    token_type_ids = jax.random.randint(k_tt, (batch, seq), 0, type_vocab_size, jnp.int32)

    out = bert_embeddings(input_ids, token_type_ids, None, params, eps=layer_norm_eps)
    out = jax.block_until_ready(out)

    ref = reference(input_ids, token_type_ids, params, eps=layer_norm_eps)
    assert out.shape == (batch, seq, hidden_size)
    assert jnp.allclose(out, ref, atol=1e-4, rtol=1e-4), "mismatch vs JAX reference"

    print("KERNEL_OK")
</pallas_src>

<mosaic_0001>
module attributes {stable_mosaic.version = 11 : i64} {
  func.func @bert_embeddings_kernel(%arg0: i32, %arg1: memref<512xi32, #tpu.memory_space<smem>>, %arg2: memref<128x1xi32, #tpu.memory_space<vmem>>, %arg3: memref<128x128xf32, #tpu.memory_space<vmem>>, %arg4: memref<2x128xf32, #tpu.memory_space<vmem>>, %arg5: memref<2x128xf32, #tpu.memory_space<vmem>>, %arg6: memref<512x128xf32, #tpu.memory_space<any>>, %arg7: memref<128x128xf32, #tpu.memory_space<vmem>>, %arg8: memref<128x128xf32, #tpu.memory_space<vmem>>, %arg9: memref<!tpu.dma_semaphore, #tpu.memory_space<semaphore_mem>>) attributes {dimension_semantics = [#tpu.dimension_semantics<parallel>], iteration_bounds = array<i64: 4>, scalar_prefetch = 1 : i64, scratch_operands = 2 : i64, tpu.core_type = #tpu.core_type<tc>, window_params = [{transform_indices = @transform_0, window_bounds = array<i64: 128, 1>}, {transform_indices = @transform_1, window_bounds = array<i64: 128, 128>}, {pipeline_mode = #tpu.pipeline_mode<synchronous>, transform_indices = @transform_2, window_bounds = array<i64: 2, 128>}, {pipeline_mode = #tpu.pipeline_mode<synchronous>, transform_indices = @transform_3, window_bounds = array<i64: 2, 128>}, {}, {transform_indices = @transform_5, window_bounds = array<i64: 128, 128>}]} {
    %c128_i32 = arith.constant 128 : i32
    %0 = arith.muli %arg0, %c128_i32 : i32
    %c0_i32 = arith.constant 0 : i32
    %c128_i32_0 = arith.constant 128 : i32
    %1 = arith.addi %c0_i32, %c128_i32_0 : i32
    %c1_i32 = arith.constant 1 : i32
    scf.for %arg10 = %c0_i32 to %1 step %c1_i32  : i32 {
      %c1_i32_25 = arith.constant 1 : i32
      %44 = arith.muli %arg10, %c1_i32_25 : i32
      %c0_i32_26 = arith.constant 0 : i32
      %45 = arith.addi %c0_i32_26, %44 : i32
      %46 = arith.addi %0, %45 : i32
      %47 = arith.index_cast %46 : i32 to index
      %48 = memref.load %arg1[%47] : memref<512xi32, #tpu.memory_space<smem>>
      %c0_i32_27 = arith.constant 0 : i32
      %49 = tpu.memref_slice %arg6[%48, %c0_i32_27] : memref<512x128xf32, #tpu.memory_space<any>> -> memref<1x128xf32, #tpu.memory_space<any>>
      %c0_i32_28 = arith.constant 0 : i32
      %50 = tpu.memref_slice %arg8[%45, %c0_i32_28] : memref<128x128xf32, #tpu.memory_space<vmem>> -> memref<1x128xf32, #tpu.memory_space<vmem>>
      tpu.enqueue_dma source(%49 : memref<1x128xf32, #tpu.memory_space<any>>) target(%50 : memref<1x128xf32, #tpu.memory_space<vmem>>) target_semaphore(%arg9 : memref<!tpu.dma_semaphore, #tpu.memory_space<semaphore_mem>>)
    }
    %c128_i32_1 = arith.constant 128 : i32
    %c0 = arith.constant 0 : index
    %c0_2 = arith.constant 0 : index
    %2 = vector.load %arg2[%c0, %c0_2] : memref<128x1xi32, #tpu.memory_space<vmem>>, vector<128x1xi32>
    %c0_3 = arith.constant 0 : index
    %c0_4 = arith.constant 0 : index
    %3 = vector.load %arg4[%c0_3, %c0_4] : memref<2x128xf32, #tpu.memory_space<vmem>>, vector<1x128xf32>
    %4 = vector.shape_cast %3 : vector<1x128xf32> to vector<1x128xf32>
    %5 = vector.broadcast %4 : vector<1x128xf32> to vector<128x128xf32>
    %c1_i32_5 = arith.constant 1 : i32
    %6 = vector.broadcast %c1_i32_5 : i32 to vector<128x1xi32>
    %7 = arith.cmpi eq, %2, %6 : vector<128x1xi32>
    %c1 = arith.constant 1 : index
    %c0_6 = arith.constant 0 : index
    %8 = vector.load %arg4[%c1, %c0_6] : memref<2x128xf32, #tpu.memory_space<vmem>>, vector<1x128xf32>
    %9 = vector.shape_cast %7 : vector<128x1xi1> to vector<128x1xi1>
    %10 = vector.broadcast %9 : vector<128x1xi1> to vector<128x128xi1>
    %11 = vector.shape_cast %8 : vector<1x128xf32> to vector<1x128xf32>
    %12 = vector.broadcast %11 : vector<1x128xf32> to vector<128x128xf32>
    %13 = arith.select %10, %12, %5 : vector<128x128xi1>, vector<128x128xf32>
    %c0_7 = arith.constant 0 : index
    %c0_8 = arith.constant 0 : index
    %14 = vector.load %arg3[%c0_7, %c0_8] : memref<128x128xf32, #tpu.memory_space<vmem>>, vector<128x128xf32>
    %15 = arith.addf %14, %13 : vector<128x128xf32>
    %c0_i32_9 = arith.constant 0 : i32
    %c128_i32_10 = arith.constant 128 : i32
    %16 = arith.addi %c0_i32_9, %c128_i32_10 : i32
    %c1_i32_11 = arith.constant 1 : i32
    scf.for %arg10 = %c0_i32_9 to %16 step %c1_i32_11  : i32 {
      %c1_i32_25 = arith.constant 1 : i32
      %44 = arith.muli %arg10, %c1_i32_25 : i32
      %c0_i32_26 = arith.constant 0 : i32
      %45 = arith.addi %c0_i32_26, %44 : i32
      %c0_i32_27 = arith.constant 0 : i32
      %c0_i32_28 = arith.constant 0 : i32
      %46 = tpu.memref_slice %arg6[%c0_i32_27, %c0_i32_28] : memref<512x128xf32, #tpu.memory_space<any>> -> memref<1x128xf32, #tpu.memory_space<any>>
      %c0_i32_29 = arith.constant 0 : i32
      %47 = tpu.memref_slice %arg8[%45, %c0_i32_29] : memref<128x128xf32, #tpu.memory_space<vmem>> -> memref<1x128xf32, #tpu.memory_space<vmem>>
      tpu.wait_dma2 semaphore(%arg9 : memref<!tpu.dma_semaphore, #tpu.memory_space<semaphore_mem>>) src(%46 : memref<1x128xf32, #tpu.memory_space<any>>) dst(%47 : memref<1x128xf32, #tpu.memory_space<vmem>>)
    }
    %c128_i32_12 = arith.constant 128 : i32
    %c0_13 = arith.constant 0 : index
    %c0_14 = arith.constant 0 : index
    %17 = vector.load %arg8[%c0_13, %c0_14] : memref<128x128xf32, #tpu.memory_space<vmem>>, vector<128x128xf32>
    %18 = arith.addf %17, %15 : vector<128x128xf32>
    %cst = arith.constant dense<0.000000e+00> : vector<128xf32>
    %19 = vector.multi_reduction <add>, %18, %cst [1] : vector<128x128xf32> to vector<128xf32>
    %20 = vector.shape_cast %19 : vector<128xf32> to vector<128x1xf32>
    %21 = arith.mulf %18, %18 : vector<128x128xf32>
    %cst_15 = arith.constant dense<0.000000e+00> : vector<128xf32>
    %22 = vector.multi_reduction <add>, %21, %cst_15 [1] : vector<128x128xf32> to vector<128xf32>
    %23 = vector.shape_cast %22 : vector<128xf32> to vector<128x1xf32>
    %cst_16 = arith.constant 7.812500e-03 : f32
    %24 = vector.broadcast %cst_16 : f32 to vector<128x1xf32>
    %25 = arith.mulf %20, %24 : vector<128x1xf32>
    %cst_17 = arith.constant 7.812500e-03 : f32
    %26 = vector.broadcast %cst_17 : f32 to vector<128x1xf32>
    %27 = arith.mulf %23, %26 : vector<128x1xf32>
    %28 = arith.mulf %25, %25 : vector<128x1xf32>
    %29 = arith.subf %27, %28 : vector<128x1xf32>
    %30 = vector.broadcast %25 : vector<128x1xf32> to vector<128x128xf32>
    %31 = arith.subf %18, %30 : vector<128x128xf32>
    %cst_18 = arith.constant 9.99999996E-13 : f32
    %32 = vector.broadcast %cst_18 : f32 to vector<128x1xf32>
    %33 = arith.addf %29, %32 : vector<128x1xf32>
    %34 = math.rsqrt %33 : vector<128x1xf32>
    %35 = vector.broadcast %34 : vector<128x1xf32> to vector<128x128xf32>
    %36 = arith.mulf %31, %35 : vector<128x128xf32>
    %c0_19 = arith.constant 0 : index
    %c0_20 = arith.constant 0 : index
    %37 = vector.load %arg5[%c0_19, %c0_20] : memref<2x128xf32, #tpu.memory_space<vmem>>, vector<1x128xf32>
    %38 = vector.broadcast %37 : vector<1x128xf32> to vector<128x128xf32>
    %39 = arith.mulf %36, %38 : vector<128x128xf32>
    %c1_21 = arith.constant 1 : index
    %c0_22 = arith.constant 0 : index
    %40 = vector.load %arg5[%c1_21, %c0_22] : memref<2x128xf32, #tpu.memory_space<vmem>>, vector<1x128xf32>
    %41 = vector.broadcast %40 : vector<1x128xf32> to vector<128x128xf32>
    %42 = arith.addf %39, %41 : vector<128x128xf32>
    %c0_23 = arith.constant 0 : index
    %c0_24 = arith.constant 0 : index
    %43 = vector.load %arg7[%c0_23, %c0_24] : memref<128x128xf32, #tpu.memory_space<vmem>>, vector<128x128xf32>
    tpu.vector_store %arg7[%c0_23, %c0_24], %42 {strides = array<i32>} : memref<128x128xf32, #tpu.memory_space<vmem>>, vector<128x128xf32>,
    return
  }
  func.func @transform_0(%arg0: i32, %arg1: memref<512xi32, #tpu.memory_space<smem>>) -> (i32, i32) {
    %c0_i32 = arith.constant 0 : i32
    %c0_i32_0 = arith.constant 0 : i32
    return %arg0, %c0_i32 : i32, i32
  }
  func.func @transform_1(%arg0: i32, %arg1: memref<512xi32, #tpu.memory_space<smem>>) -> (i32, i32) {
    %c1_i32 = arith.constant 1 : i32
    %c0_i32 = arith.constant 0 : i32
    %0 = arith.cmpi eq, %c1_i32, %c0_i32 : i32
    %c1_i32_0 = arith.constant 1 : i32
    %1 = arith.select %0, %c1_i32_0, %c1_i32 : i32
    %2 = arith.remsi %arg0, %1 : i32
    %c0_i32_1 = arith.constant 0 : i32
    %3 = arith.cmpi ne, %2, %c0_i32_1 : i32
    %c0_i32_2 = arith.constant 0 : i32
    %4 = arith.cmpi slt, %2, %c0_i32_2 : i32
    %c0_i32_3 = arith.constant 0 : i32
    %5 = arith.cmpi slt, %1, %c0_i32_3 : i32
    %6 = arith.xori %4, %5 : i1
    %7 = arith.andi %6, %3 : i1
    %8 = arith.addi %2, %1 : i32
    %9 = arith.select %7, %8, %2 : i32
    %c0_i32_4 = arith.constant 0 : i32
    %c0_i32_5 = arith.constant 0 : i32
    return %9, %c0_i32_4 : i32, i32
  }
  func.func @transform_2(%arg0: i32, %arg1: memref<512xi32, #tpu.memory_space<smem>>) -> (i32, i32) {
    %c0_i32 = arith.constant 0 : i32
    %c0_i32_0 = arith.constant 0 : i32
    %c0_i32_1 = arith.constant 0 : i32
    return %c0_i32, %c0_i32_0 : i32, i32
  }
  func.func @transform_3(%arg0: i32, %arg1: memref<512xi32, #tpu.memory_space<smem>>) -> (i32, i32) {
    %c0_i32 = arith.constant 0 : i32
    %c0_i32_0 = arith.constant 0 : i32
    %c0_i32_1 = arith.constant 0 : i32
    return %c0_i32, %c0_i32_0 : i32, i32
  }
  func.func @transform_5(%arg0: i32, %arg1: memref<512xi32, #tpu.memory_space<smem>>) -> (i32, i32) {
    %c0_i32 = arith.constant 0 : i32
    %c0_i32_0 = arith.constant 0 : i32
    return %arg0, %c0_i32 : i32, i32
  }
}

</mosaic_0001>

<bundles_post_ra>
// kernel: tpu_custom_call.1
= control target key start
LH: loop header
LB: loop body
LE: loop exit
PB: predicated region body
PF: predicated region fallthrough
CT: control target
= control target key end

     0   :  { %s1682_s0 = inlined_call_operand.vmem [shape: s32[512], index: 0, kind: input, shape index: {}]   ;;  %s1683_s1 = inlined_call_operand.vmem [shape: s32[512,1], index: 1, kind: input, shape index: {}]   ;;  %s1684_s2 = inlined_call_operand.hbm [shape: f32[128,128], index: 2, kind: input, shape index: {}]   ;;  %s1685_s3 = inlined_call_operand.vmem [shape: f32[2,128], index: 3, kind: input, shape index: {}]   ;;  %s1686_s4 = inlined_call_operand.vmem [shape: f32[2,128], index: 4, kind: input, shape index: {}]   ;;  %s1687_s5 = inlined_call_operand.vmem [shape: f32[512,128], index: 5, kind: input, shape index: {}]   ;;  %s1688_s6 = inlined_call_operand.hbm [shape: f32[512,128], index: 6, kind: output, shape index: {}]  }
   0x1   :  { %s11_s23 = sshll.u32 %s1682_s0, 4  ;;  %s12_s23 = int_to_ptr.vmem [resolvable:$true] %s11_s23 }
   0x2   :  { %s997_s24 = scalar_lea.vmem %s12_s23, 64  ;;  %p1002_p1 = scmp.lt.s32.totalorder %s12_s23, %s12_s23 }
   0x3   :  { %p998_p0 = scmp.ne.s32.totalorder %s12_s23, %s997_s24  ;;  %p1003_p2 = scmp.lt.s32.totalorder %s997_s24, %s997_s24 }
   0x5   :  { %p1004_p3 = por %p1003_p2, %p1002_p1 }
   0x7   :  { %p1005_p4 = pnand %p1004_p3, %p998_p0 }
   0x9   :  { %1008 = shalt.err (!%p1005_p4)  }
   0xa   :  { %s1125_s25 = smov [#allocation5]  }
   0xb   :  { %14 = dma.vmem_to_smem %s12_s23, 64, %s1125_s25, [#allocation4] }
   0xc   :  { %1089 = dma.done.wait [#allocation4], 64 }
   0xd   :  { %1090 = vsyncadd [#allocation4], 4294967232 }
   0xe   :  { %16 = sfence }
   0xf   :  { %17 = vsyncpa [#allocation7], 0 }
  0x10   :  { %18 = vsyncpa [#allocation8], 0 }
  0x11   :  { %20 = vsyncpa [#allocation8 + $0x1], 0  ;;  %s1171_s26 = smov 0   ;;  %s1173_s27 = smov 0  }
  0x12   :  { %s1175_s0 = smov 0   ;;  %s1177_s28 = smov 0  }
  0x13 LB: > { %s1192_s29 = sadd.s32 4294967295, %s1115_s28   ;;  %s870_s30 = sadd.s32 4294967294, %s1115_s28   ;;  %s1115_s28 = sphi %s1177_s28, %s1704_s28   ;;  %s1111_s0 = sphi %s1175_s0, %s1703_s0   ;;  %s1107_s27 = sphi %s1173_s27, %s1702_s27   ;;  %s1103_s26 = sphi %s1171_s26, %s1701_s26  }
  0x14   : > { %s1196_s7 = sadd.s32 1, %s1115_s28   ;;  %s122_s8 = sadd.s32 1, %s1111_s0 }
  0x15   : > { %s119_s9 = ssub.s32 %s1115_s28, %s1196_s7  ;;  %p132_p5 = scmp.ne.s32.totalorder %s1111_s0, %s1107_s27 }
  0x16   : > { %p120_p6 = scmp.eq.s32.totalorder %s119_s9, 0  ;;  %p133_p7 = scmp.eq.s32.totalorder %s1192_s29, 3 }
  0x17   : > { %p138_p8 = scmp.ne.s32.totalorder %s1107_s27, %s1103_s26  ;;  %p139_p9 = scmp.eq.s32.totalorder %s870_s30, 3 }
  0x18   : > { %s1207_s10 = scalar_select %p120_p6, %s1111_s0, %s122_s8  }
  0x19   : > { %p1209_p10 = por %p133_p7, %p132_p5  ;;  %p1213_p11 = por %p139_p9, %p138_p8 }
  0x1a   : > { %p871_p12 = scmp.ge.s32.totalorder %s1115_s28, 1  ;;  %p146_p13 = scmp.lt.s32.totalorder %s1115_s28, 5 }
  0x1b   : > { %s1692_s11 = scalar_select %p1209_p10, 1, 0 }
  0x1c   : > { %s1693_s12 = scalar_select %p1213_p11, 1, 0 }
  0x1d   : > { %p1689_p0 = scmp.eq.s32.totalorder %s1192_s29, 0  ;;  %p1220_p1 = pnand %p871_p12, %p146_p13 }
  0x1e   : > { %s1126_s14 = smov [#allocation6]   ;;  %s1009_s19 = scalar_lea.hbm %s1684_s2, 2048 }
  0x1f   : > { %s1694_s13 = scalar_select %p1220_p1, 1, 0 }
  0x20   : > { %s158_s15 = sshll.u32 %s1126_s14, 4  ;;  %p897_p2 = pneg %p1220_p1  ;;  %s159_s15 = int_to_ptr.vmem [resolvable:$true] %s158_s15 }
  0x21   : > { %p1010_p4 = scmp.ne.s32.totalorder %s1684_s2, %s1009_s19  ;;  %p1016_p8 = scmp.lt.u32.totalorder %s1009_s19, %s1684_s2 }
  0x22   : > { %p1228_p3 = pnand %p1689_p0, %p897_p2 }
  0x24   : > { %p1011_p5 = pneg %p1228_p3 }
  0x26   : > { %p1012_p6 = pnand %p1011_p5, %p1010_p4 }
  0x28   : > { %p1013_p7 = pneg %p1012_p6 }
  0x2a   : > { %p1018_p9 = pnand %p1016_p8, %p1013_p7 }
  0x2c   : > { %1021 = shalt.err (!%p1018_p9)
}
  0x2d   : > { %s1022_s24 = scalar_lea.vmem %s159_s15, 2048  ;;  %p1030_p0 = scmp.lt.s32.totalorder %s159_s15, %s159_s15 }
  0x2e   : > { %p1023_p12 = scmp.ne.s32.totalorder %s159_s15, %s1022_s24  ;;  %p1031_p11 = scmp.lt.s32.totalorder %s1022_s24, %s1022_s24 }
  0x30   : > { %p1025_p13 = pnand %p1023_p12, %p1011_p5  ;;  %p1032_p10 = por %p1031_p11, %p1030_p0 }
  0x32   : > { %p1026_p2 = pneg %p1025_p13 }
  0x34   : > { %p1033_p1 = pnand %p1032_p10, %p1026_p2 }
  0x36   : > { %1036 = shalt.err (!%p1033_p1)
}
  0x37   : > { %s1127_s25 = smov 128   ;;  %s1128_s30 = smov 8  }
  0x38   : > { %900 = dma.hbm_to_vmem [thread:$0]  (!%p1228_p3), %s1684_s2, 2048, %s159_s15, [#allocation7], %s1127_s25, %s1127_s25, %s1128_s30  }
  0x39   : > { %p1696_p4 = scmp.ne.s32.totalorder %s1694_s13, 0 }
  0x3a   : > { %p1697_p6 = scmp.eq.s32.totalorder (!%p1696_p4), %s1192_s29, 0 }
  0x3b   : > { %189 = sbr.rel (%p1696_p4) target bundleno = 494 (0x1ee), region = 36 }
  0x42   : > { %1092 = dma.done.wait (%p1697_p6), [#allocation7], 2048   ;;  %p1698_p5 = pmov %p1697_p6 }
  0x43   : > { %s212_s14 = sand.u32 1, %s1107_s27   ;;  %s877_s17 = sshll.u32 %s1192_s29, 4 }
  0x44   : > { %1094 = vsyncadd (%p1698_p5), [#allocation7], 4294965248  ;;  %s876_s16 = sshll.u32 %s212_s14, 7  ;;  %p216_p10 = scmp.lt.s32.totalorder %s877_s17, 63 }
  0x45   : > { %s879_s18 = sshll.u32 %s1192_s29, 7  ;;  %s1264_s21 = scalar_lea.vmem [#allocation9], %s876_s16 }
  0x46   : > { %s1706_s17 = smov (!%p216_p10, %s877_s17), 63  ;;  %s1117_s22 = smov 0  }
  0x47   : > { %s878_s15 = sshll.u32 %s1706_s17, 3 }
  0x48   : > { %s1262_s20 = scalar_lea.vmem %s1683_s1, %s878_s15 }
  0x49 LB: >> { %s229_s23 = sadd.s32 %s1119_s22, %s879_s18  ;;  %s232_s9 = scalar_lea.vmem [#allocation2], %s1119_s22  ;;  %s1119_s22 = sphi %s1117_s22, %s228_s22  }
  0x4a   : >> { %s230_s24 = sld [smem:[#allocation5 + %s229_s23]] }
  0x50   : >> { %s231_s8 = scalar_lea.vmem %s1687_s5, %s230_s24 }
  0x51   : >> { %v250_v0 = vld [vmem:[%s231_s8] sm:$0x1] }
  0x52   : >> { %251 = vst [vmem:[%s232_s9] sm:$0x1] %v250_v0 }
  0x53   : >> { %276 = vsyncadd [#allocation3], 16  ;;  %s228_s22 = sadd.s32 1, %s1119_s22  }
  0x54   : >> { %p225_p11 = scmp.ge.s32.totalorder %s228_s22, 128  }
  0x55   : > { %v279_v1 = vld [vmem:[%s1262_s20 + $0x10] sm:$0xff] (%p225_p11)  ;;  %v277_v2 = vld [vmem:[%s1262_s20] sm:$0xff] (%p225_p11)  ;;  %v280_v3 = vld [vmem:[%s1262_s20 + $0x18] sm:$0xff] (%p225_p11)  ;;  %v1129_v4 = vmov (%p225_p11), 0   ;;  %s1121_s13 = smov (%p225_p11), 0  }
  0x56   : > { %227 = sbr.rel (!%p225_p11) target bundleno = 73 (0x49), region = 132  ;;  %964 = vset.pattern.permute.xlu1 (%p225_p11), %v1129_v4  ;;  %963 = vset.pattern.permute.xlu0 (%p225_p11), %v1129_v4  ;;  %vm300_vm0 = vcmp.eq.s32.totalorder (%p225_p11), %v279_v1, 1  ;;  %vm298_vm1 = vcmp.eq.s32.totalorder (%p225_p11), %v277_v2, 1  ;;  %vm301_vm2 = vcmp.eq.s32.totalorder (%p225_p11), %v280_v3, 1  ;;  %v278_v5 = vld [vmem:[%s1262_s20 + $0x8] sm:$0xff] (%p225_p11)  ;;  %v281_v9 = vld [vmem:[%s1262_s20 + $0x20] sm:$0xff] (%p225_p11) }
  0x57   : > { %v317_v6 = vsel (%p225_p11), %vm300_vm0, 1, %v1129_v4  ;;  %v315_v7 = vsel (%p225_p11), %vm298_vm1, 1, %v1129_v4  ;;  %vm299_vm3 = vcmp.eq.s32.totalorder (%p225_p11), %v278_v5, 1  ;;  %v282_v8 = vld [vmem:[%s1262_s20 + $0x28] sm:$0xff] (%p225_p11)  ;;  %v318_v10 = vsel (%p225_p11), %vm301_vm2, 1, %v1129_v4  ;;  %v284_v12 = vld [vmem:[%s1262_s20 + $0x38] sm:$0xff] (%p225_p11) }
  0x58   : > { %338 = vperm.xlu1 (%p225_p11), %964, %v317_v6   ;;  %332 = vperm.xlu0 (%p225_p11), %963, %v315_v7   ;;  %v316_v11 = vsel (%p225_p11), %vm299_vm3, 1, %v1129_v4  ;;  %vm303_vm4 = vcmp.eq.s32.totalorder (%p225_p11), %v282_v8, 1  ;;  %vm302_vm5 = vcmp.eq.s32.totalorder (%p225_p11), %v281_v9, 1  ;;  %v283_v13 = vld [vmem:[%s1262_s20 + $0x30] sm:$0xff] (%p225_p11)  ;;  %vm305_vm6 = vcmp.eq.s32.totalorder (%p225_p11), %v284_v12, 1  ;;  %v286_v16 = vld [vmem:[%s1262_s20 + $0x48] sm:$0xff] (%p225_p11) }
  0x59   : > { %v320_v14 = vsel (%p225_p11), %vm303_vm4, 1, %v1129_v4  ;;  %v319_v15 = vsel (%p225_p11), %vm302_vm5, 1, %v1129_v4  ;;  %vm304_vm7 = vcmp.eq.s32.totalorder (%p225_p11), %v283_v13, 1  ;;  %v285_v17 = vld [vmem:[%s1262_s20 + $0x40] sm:$0xff] (%p225_p11)  ;;  %v322_v18 = vsel (%p225_p11), %vm305_vm6, 1, %v1129_v4  ;;  %v288_v20 = vld [vmem:[%s1262_s20 + $0x58] sm:$0xff] (%p225_p11) }
  0x5a   : > { %v321_v19 = vsel (%p225_p11), %vm304_vm7, 1, %v1129_v4  ;;  %vm307_vm8 = vcmp.eq.s32.totalorder (%p225_p11), %v286_v16, 1  ;;  %vm306_vm9 = vcmp.eq.s32.totalorder (%p225_p11), %v285_v17, 1  ;;  %v287_v21 = vld [vmem:[%s1262_s20 + $0x50] sm:$0xff] (%p225_p11)  ;;  %vm309_vm10 = vcmp.eq.s32.totalorder (%p225_p11), %v288_v20, 1  ;;  %v290_v24 = vld [vmem:[%s1262_s20 + $0x68] sm:$0xff] (%p225_p11) }
  0x5b   : > { %v324_v22 = vsel (%p225_p11), %vm307_vm8, 1, %v1129_v4  ;;  %v323_v23 = vsel (%p225_p11), %vm306_vm9, 1, %v1129_v4  ;;  %vm308_vm11 = vcmp.eq.s32.totalorder (%p225_p11), %v287_v21, 1  ;;  %v289_v25 = vld [vmem:[%s1262_s20 + $0x60] sm:$0xff] (%p225_p11)  ;;  %v326_v26 = vsel (%p225_p11), %vm309_vm10, 1, %v1129_v4  ;;  %v292_v28 = vld [vmem:[%s1262_s20 + $0x78] sm:$0xff] (%p225_p11) }
  0x5c   : > { %341 = vperm.xlu1 (%p225_p11), %964, %v318_v10   ;;  %335 = vperm.xlu0 (%p225_p11), %963, %v316_v11   ;;  %v325_v27 = vsel (%p225_p11), %vm308_vm11, 1, %v1129_v4  ;;  %vm311_vm12 = vcmp.eq.s32.totalorder (%p225_p11), %v290_v24, 1  ;;  %vm310_vm13 = vcmp.eq.s32.totalorder (%p225_p11), %v289_v25, 1  ;;  %v291_v29 = vld [vmem:[%s1262_s20 + $0x70] sm:$0xff] (%p225_p11)  ;;  %vm313_vm14 = vcmp.eq.s32.totalorder (%p225_p11), %v292_v28, 1  ;;  %v415_v38 = vld [vmem:[#allocation6] sm:$0xff] (%p225_p11) }
  0x5d   : > { %v328_v30 = vsel %vm311_vm12, 1, %v1129_v4  ;;  %v327_v31 = vsel %vm310_vm13, 1, %v1129_v4  ;;  %vm312_vm15 = vcmp.eq.s32.totalorder %v291_v29, 1  ;;  %v330_v32 = vsel %vm313_vm14, 1, %v1129_v4  ;;  %v1288_v34 = vld [vmem:[%s1685_s3] ss:$0 sm:$0xff] }
  0x5e   : > { %v329_v33 = vsel %vm312_vm15, 1, %v1129_v4  ;;  %v1293_v35 = vld [vmem:[%s1685_s3 + $0x1] ss:$0 sm:$0xff]  ;;  %v417_v36 = vld [vmem:[#allocation6 + $0x10] sm:$0xff]  ;;  %v418_v44 = vld [vmem:[#allocation6 + $0x18] sm:$0xff] }
  0x5f   : > { %v416_v46 = vld [vmem:[#allocation6 + $0x8] sm:$0xff]  ;;  %v419_v54 = vld [vmem:[#allocation6 + $0x20] sm:$0xff]  ;;  %v422_v60 = vld [vmem:[#allocation6 + $0x38] sm:$0xff] }
  0x60   : > { %347 = vperm.xlu1 %964, %v320_v14   ;;  %344 = vperm.xlu0 %963, %v319_v15   ;;  %v420_v52 = vld [vmem:[#allocation6 + $0x28] sm:$0xff]  ;;  %v421_v62 = vld [vmem:[#allocation6 + $0x30] sm:$0xff]  ;;  %v423_v6 = vld [vmem:[#allocation6 + $0x40] sm:$0xff] }
  0x61   : > { %v424_v4 = vld [vmem:[#allocation6 + $0x48] sm:$0xff]  ;;  %v426_v12 = vld [vmem:[#allocation6 + $0x58] sm:$0xff]  ;;  %v425_v14 = vld [vmem:[#allocation6 + $0x50] sm:$0xff] }
  0x62   : > { %v428_v20 = vld [vmem:[#allocation6 + $0x68] sm:$0xff]  ;;  %v430_v28 = vld [vmem:[#allocation6 + $0x78] sm:$0xff] }
  0x64   : > { %353 = vperm.xlu1 %964, %v322_v18   ;;  %350 = vperm.xlu0 %963, %v321_v19  }
  0x68   : > { %359 = vperm.xlu1 %964, %v324_v22   ;;  %356 = vperm.xlu0 %963, %v323_v23   ;;  %v427_v22 = vld [vmem:[#allocation6 + $0x60] sm:$0xff] }
  0x6c   : > { %365 = vperm.xlu1 %964, %v326_v26   ;;  %362 = vperm.xlu0 %963, %v325_v27  }
  0x70   : > { %371 = vperm.xlu1 %964, %v328_v30   ;;  %368 = vperm.xlu0 %963, %v327_v31   ;;  %v429_v30 = vld [vmem:[#allocation6 + $0x70] sm:$0xff] }
  0x74   : > { %377 = vperm.xlu1 %964, %v330_v32   ;;  %374 = vperm.xlu0 %963, %v329_v33  }
  0xd7   : > { %v339_v37 = vpop.permute.xlu1 %338  ;;  %v333_v39 = vpop.permute.xlu0 %332 }
  0xd8   : > { %vm381_vm0 = vcmp.eq.s32.totalorder %v339_v37, 1  ;;  %vm379_vm1 = vcmp.eq.s32.totalorder %v333_v39, 1 }
  0xd9   : > { %v401_v40 = vsel %vm381_vm0, %v1293_v35, %v1288_v34  ;;  %v399_v41 = vsel %vm379_vm1, %v1293_v35, %v1288_v34 }
  0xda   : > { %v1299_v42 = vadd.f32 %v417_v36, %v401_v40  ;;  %v1301_v43 = vadd.f32 %v415_v38, %v399_v41 }
  0xdb   : > { %v342_v45 = vpop.permute.xlu1 %341  ;;  %v336_v47 = vpop.permute.xlu0 %335 }
  0xdc   : > { %vm382_vm2 = vcmp.eq.s32.totalorder %v342_v45, 1  ;;  %vm380_vm3 = vcmp.eq.s32.totalorder %v336_v47, 1 }
  0xdd   : > { %v402_v48 = vsel %vm382_vm2, %v1293_v35, %v1288_v34  ;;  %v400_v49 = vsel %vm380_vm3, %v1293_v35, %v1288_v34 }
  0xde   : > { %v1307_v50 = vadd.f32 %v418_v44, %v402_v48  ;;  %v1309_v51 = vadd.f32 %v416_v46, %v400_v49 }
  0xdf   : > { %v348_v53 = vpop.permute.xlu1 %347  ;;  %v345_v55 = vpop.permute.xlu0 %344 }
  0xe0   : > { %vm384_vm4 = vcmp.eq.s32.totalorder %v348_v53, 1  ;;  %vm383_vm5 = vcmp.eq.s32.totalorder %v345_v55, 1 }
  0xe1   : > { %v404_v56 = vsel %vm384_vm4, %v1293_v35, %v1288_v34  ;;  %v403_v57 = vsel %vm383_vm5, %v1293_v35, %v1288_v34 }
  0xe2   : > { %v1315_v58 = vadd.f32 %v420_v52, %v404_v56  ;;  %v1317_v59 = vadd.f32 %v419_v54, %v403_v57 }
  0xe3   : > { %v354_v61 = vpop.permute.xlu1 %353  ;;  %v351_v63 = vpop.permute.xlu0 %350 }
  0xe4   : > { %vm386_vm6 = vcmp.eq.s32.totalorder %v354_v61, 1  ;;  %vm385_vm7 = vcmp.eq.s32.totalorder %v351_v63, 1 }
  0xe5   : > { %v406_v0 = vsel %vm386_vm6, %v1293_v35, %v1288_v34  ;;  %v405_v1 = vsel %vm385_vm7, %v1293_v35, %v1288_v34 }
  0xe6   : > { %v1323_v2 = vadd.f32 %v422_v60, %v406_v0  ;;  %v1325_v3 = vadd.f32 %v421_v62, %v405_v1 }
  0xe7   : > { %v360_v5 = vpop.permute.xlu1 %359  ;;  %v357_v7 = vpop.permute.xlu0 %356 }
  0xe8   : > { %vm388_vm8 = vcmp.eq.s32.totalorder %v360_v5, 1  ;;  %vm387_vm9 = vcmp.eq.s32.totalorder %v357_v7, 1 }
  0xe9   : > { %v408_v8 = vsel %vm388_vm8, %v1293_v35, %v1288_v34  ;;  %v407_v9 = vsel %vm387_vm9, %v1293_v35, %v1288_v34 }
  0xea   : > { %v1331_v10 = vadd.f32 %v424_v4, %v408_v8  ;;  %v1333_v11 = vadd.f32 %v423_v6, %v407_v9 }
  0xeb   : > { %v366_v13 = vpop.permute.xlu1 %365  ;;  %v363_v15 = vpop.permute.xlu0 %362 }
  0xec   : > { %vm390_vm10 = vcmp.eq.s32.totalorder %v366_v13, 1  ;;  %vm389_vm11 = vcmp.eq.s32.totalorder %v363_v15, 1 }
  0xed   : > { %v410_v16 = vsel %vm390_vm10, %v1293_v35, %v1288_v34  ;;  %v409_v17 = vsel %vm389_vm11, %v1293_v35, %v1288_v34 }
  0xee   : > { %v1339_v18 = vadd.f32 %v426_v12, %v410_v16  ;;  %v1341_v19 = vadd.f32 %v425_v14, %v409_v17 }
  0xef   : > { %v372_v21 = vpop.permute.xlu1 %371  ;;  %v369_v23 = vpop.permute.xlu0 %368 }
  0xf0   : > { %vm392_vm12 = vcmp.eq.s32.totalorder %v372_v21, 1  ;;  %vm391_vm13 = vcmp.eq.s32.totalorder %v369_v23, 1 }
  0xf1   : > { %v412_v24 = vsel %vm392_vm12, %v1293_v35, %v1288_v34  ;;  %v411_v25 = vsel %vm391_vm13, %v1293_v35, %v1288_v34 }
  0xf2   : > { %v444_v26 = vadd.f32 %v428_v20, %v412_v24  ;;  %v443_v27 = vadd.f32 %v427_v22, %v411_v25 }
  0xf3   : > { %v378_v29 = vpop.permute.xlu1 %377  ;;  %v375_v31 = vpop.permute.xlu0 %374 }
  0xf4   : > { %vm394_vm14 = vcmp.eq.s32.totalorder %v378_v29, 1  ;;  %vm393_vm15 = vcmp.eq.s32.totalorder %v375_v31, 1 }
  0xf5   : > { %v414_v32 = vsel %vm394_vm14, %v1293_v35, %v1288_v34  ;;  %v413_v33 = vsel %vm393_vm15, %v1293_v35, %v1288_v34 }
  0xf6   : > { %v446_v36 = vadd.f32 %v430_v28, %v414_v32  ;;  %v445_v37 = vadd.f32 %v429_v30, %v413_v33 }
  0xf7 LB: >> { %1095 = dma.done.wait [#allocation3], 16  ;;  %s1123_s13 = sphi %s1121_s13, %s452_s13  }
  0xf8   : >> { %1096 = vsyncadd [#allocation3], 4294967280  ;;  %s452_s13 = sadd.s32 1, %s1123_s13  }
  0xf9   : >> { %p449_p0 = scmp.ge.s32.totalorder %s452_s13, 128  }
  0xfa   : > { %v458_v38 = vld [vmem:[#allocation2 + $0x10] sm:$0xff] (%p449_p0)  ;;  %v456_v39 = vld [vmem:[#allocation2] sm:$0xff] (%p449_p0)  ;;  %v459_v40 = vld [vmem:[#allocation2 + $0x18] sm:$0xff] (%p449_p0)  ;;  %s890_s24 = sshll.u32 (%p449_p0), %s1192_s29, 11  ;;  %s768_s25 = sshll.u32 (%p449_p0), %s1264_s21, 4  ;;  %s1634_s25 = int_to_ptr.vmem [resolvable:$true] %s768_s25 }
  0xfb   : > { %451 = sbr.rel (!%p449_p0) target bundleno = 247 (0xf7), region = 143  ;;  %v1352_v41 = vadd.f32 (%p449_p0), %v458_v38, %v1299_v42  ;;  %v1355_v34 = vadd.f32 (%p449_p0), %v456_v39, %v1301_v43  ;;  %v457_v35 = vld [vmem:[#allocation2 + $0x8] sm:$0xff] (%p449_p0)  ;;  %v1360_v44 = vadd.f32 (%p449_p0), %v459_v40, %v1307_v50  ;;  %v460_v47 = vld [vmem:[#allocation2 + $0x20] sm:$0xff] (%p449_p0)  ;;  %v463_v48 = vld [vmem:[#allocation2 + $0x38] sm:$0xff] (%p449_p0)  ;;  %s1632_s9 = scalar_lea.hbm (%p449_p0), %s1688_s6, %s890_s24 }
  0xfc   : > { %v1363_v45 = vadd.f32 (%p449_p0), %v457_v35, %v1309_v51  ;;  %v461_v46 = vld [vmem:[#allocation2 + $0x28] sm:$0xff] (%p449_p0)  ;;  %v1371_v43 = vadd.f32 (%p449_p0), %v460_v47, %v1317_v59  ;;  %v462_v49 = vld [vmem:[#allocation2 + $0x30] sm:$0xff] (%p449_p0)  ;;  %v1376_v50 = vadd.f32 (%p449_p0), %v463_v48, %v1323_v2  ;;  %v464_v53 = vld [vmem:[#allocation2 + $0x40] sm:$0xff] (%p449_p0)  ;;  %s1641_s29 = scalar_lea.sflag (%p449_p0), [#allocation8], %s212_s14  ;;  %s1037_s17 = scalar_lea.vmem (%p449_p0), %s1634_s25, 2048 }
  0xfd   : > { %492 = vadd.xlane.f32.xlu1 (%p449_p0), %v1352_v41  ;;  %488 = vadd.xlane.f32.xlu0 (%p449_p0), %v1355_v34  ;;  %v1368_v42 = vadd.f32 (%p449_p0), %v461_v46, %v1315_v58  ;;  %v1379_v51 = vadd.f32 (%p449_p0), %v462_v49, %v1325_v3  ;;  %v465_v52 = vld [vmem:[#allocation2 + $0x48] sm:$0xff] (%p449_p0)  ;;  %v1387_v55 = vadd.f32 (%p449_p0), %v464_v53, %v1333_v11  ;;  %v467_v56 = vld [vmem:[#allocation2 + $0x58] sm:$0xff] (%p449_p0)  ;;  %v466_v57 = vld [vmem:[#allocation2 + $0x50] sm:$0xff] (%p449_p0)  ;;  %p1038_p1 = scmp.ne.s32.totalorder (%p449_p0), %s1634_s25, %s1037_s17  ;;  %p1699_p3 = scmp.ne.s32.totalorder (%p449_p0), %s1692_s11, 0 }
  0xfe   : > { %v1384_v54 = vadd.f32 (%p449_p0), %v465_v52, %v1331_v10  ;;  %v1392_v58 = vadd.f32 (%p449_p0), %v467_v56, %v1339_v18  ;;  %v1395_v59 = vadd.f32 (%p449_p0), %v466_v57, %v1341_v19  ;;  %v469_v60 = vld [vmem:[#allocation2 + $0x68] sm:$0xff] (%p449_p0)  ;;  %v468_v61 = vld [vmem:[#allocation2 + $0x60] sm:$0xff] (%p449_p0)  ;;  %v471_v0 = vld [vmem:[#allocation2 + $0x78] sm:$0xff] (%p449_p0)  ;;  %v521_v4 = vmul.f32 (%p449_p0), %v1363_v45, %v1363_v45  ;;  %s1130_s16 = smov (%p449_p0), [#allocation9]  }
  0xff   : > { %v1399_v62 = vadd.f32 (%p449_p0), %v469_v60, %v444_v26  ;;  %v1401_v63 = vadd.f32 (%p449_p0), %v468_v61, %v443_v27  ;;  %v470_v1 = vld [vmem:[#allocation2 + $0x70] sm:$0xff] (%p449_p0)  ;;  %v1405_v2 = vadd.f32 (%p449_p0), %v471_v0, %v446_v36  ;;  %v520_v5 = vmul.f32 (%p449_p0), %v1355_v34, %v1355_v34  ;;  %p1039_p7 = pnand (%p449_p0), %p1038_p1, %p1699_p3  ;;  %s1041_s18 = sshll.u32 (%p449_p0), %s1130_s16, 4  ;;  %s1042_s18 = int_to_ptr.vmem [resolvable:$false] %s1041_s18 }
 0x100   : > { %v1407_v3 = vadd.f32 (%p449_p0), %v470_v1, %v445_v37  ;;  %v523_v6 = vmul.f32 (%p449_p0), %v1360_v44, %v1360_v44  ;;  %v522_v7 = vmul.f32 (%p449_p0), %v1352_v41, %v1352_v41  ;;  %v525_v8 = vmul.f32 (%p449_p0), %v1368_v42, %v1368_v42  ;;  %s1043_s15 = scalar_lea.vmem (%p449_p0), %s1042_s18, 4096  ;;  %p1044_p9 = scmp.lt.s32.totalorder (%p449_p0), %s1634_s25, %s1042_s18 }
 0x101   : > { %494 = vadd.xlane.f32.xlu1 (%p449_p0), %v1360_v44  ;;  %490 = vadd.xlane.f32.xlu0 (%p449_p0), %v1363_v45  ;;  %v524_v9 = vmul.f32 (%p449_p0), %v1371_v43, %v1371_v43  ;;  %v527_v10 = vmul.f32 (%p449_p0), %v1376_v50, %v1376_v50  ;;  %v526_v11 = vmul.f32 (%p449_p0), %v1379_v51, %v1379_v51  ;;  %p1040_p8 = pneg (%p449_p0), %p1039_p7  ;;  %p1045_p12 = scmp.lt.s32.totalorder (%p449_p0), %s1043_s15, %s1037_s17 }
 0x102   : > { %v529_v12 = vmul.f32 %v1384_v54, %v1384_v54  ;;  %v528_v13 = vmul.f32 %v1387_v55, %v1387_v55  ;;  %v531_v14 = vmul.f32 %v1392_v58, %v1392_v58  ;;  %v530_v15 = vmul.f32 %v1395_v59, %v1395_v59 }
 0x103   : > { %v533_v16 = vmul.f32 %v1399_v62, %v1399_v62  ;;  %v532_v17 = vmul.f32 %v1401_v63, %v1401_v63  ;;  %v535_v18 = vmul.f32 %v1405_v2, %v1405_v2  ;;  %v534_v19 = vmul.f32 %v1407_v3, %v1407_v3  ;;  %p1046_p13 = por %p1045_p12, %p1044_p9 }
 0x105   : > { %498 = vadd.xlane.f32.xlu1 %v1368_v42  ;;  %496 = vadd.xlane.f32.xlu0 %v1371_v43  ;;  %p1047_p2 = pnand %p1046_p13, %p1040_p8 }
 0x109   : > { %502 = vadd.xlane.f32.xlu1 %v1376_v50  ;;  %500 = vadd.xlane.f32.xlu0 %v1379_v51 }
 0x10d   : > { %506 = vadd.xlane.f32.xlu1 %v1384_v54  ;;  %504 = vadd.xlane.f32.xlu0 %v1387_v55 }
 0x111   : > { %510 = vadd.xlane.f32.xlu1 %v1392_v58  ;;  %508 = vadd.xlane.f32.xlu0 %v1395_v59 }
 0x115   : > { %514 = vadd.xlane.f32.xlu1 %v1399_v62  ;;  %512 = vadd.xlane.f32.xlu0 %v1401_v63 }
 0x119   : > { %518 = vadd.xlane.f32.xlu1 %v1405_v2  ;;  %516 = vadd.xlane.f32.xlu0 %v1407_v3 }
 0x11d   : > { %538 = vadd.xlane.f32.xlu1 %v521_v4  ;;  %536 = vadd.xlane.f32.xlu0 %v520_v5 }
 0x121   : > { %542 = vadd.xlane.f32.xlu1 %v523_v6  ;;  %540 = vadd.xlane.f32.xlu0 %v522_v7 }
 0x125   : > { %546 = vadd.xlane.f32.xlu1 %v525_v8  ;;  %544 = vadd.xlane.f32.xlu0 %v524_v9 }
 0x129   : > { %550 = vadd.xlane.f32.xlu1 %v527_v10  ;;  %548 = vadd.xlane.f32.xlu0 %v526_v11 }
 0x12d   : > { %554 = vadd.xlane.f32.xlu1 %v529_v12  ;;  %552 = vadd.xlane.f32.xlu0 %v528_v13 }
 0x131   : > { %558 = vadd.xlane.f32.xlu1 %v531_v14  ;;  %556 = vadd.xlane.f32.xlu0 %v530_v15 }
 0x135   : > { %562 = vadd.xlane.f32.xlu1 %v533_v16  ;;  %560 = vadd.xlane.f32.xlu0 %v532_v17 }
 0x139   : > { %566 = vadd.xlane.f32.xlu1 %v535_v18  ;;  %564 = vadd.xlane.f32.xlu0 %v534_v19 }
 0x18a   : > { %v493_v20 = vpop.xlane.xlu1 %492  ;;  %v489_v21 = vpop.xlane.xlu0 %488 }
 0x18b   : > { %v1455_v38 = vmul.f32 0.0078125, %v489_v21  ;;  %v1459_v40 = vmul.f32 0.0078125, %v493_v20 }
 0x18d   : > { %v600_v48 = vmul.f32 %v1455_v38, %v1455_v38  ;;  %v602_v61 = vmul.f32 %v1459_v40, %v1459_v40 }
 0x18e   : > { %v495_v22 = vpop.xlane.xlu1 %494  ;;  %v491_v23 = vpop.xlane.xlu0 %490 }
 0x18f   : > { %v1457_v39 = vmul.f32 0.0078125, %v491_v23  ;;  %v1461_v35 = vmul.f32 0.0078125, %v495_v22  ;;  %v634_v22 = vsub.f32 %v1352_v41, %v1459_v40  ;;  %v632_v23 = vsub.f32 %v1355_v34, %v1455_v38 }
 0x191   : > { %v601_v49 = vmul.f32 %v1457_v39, %v1457_v39  ;;  %v603_v0 = vmul.f32 %v1461_v35, %v1461_v35 }
 0x192   : > { %v499_v24 = vpop.xlane.xlu1 %498  ;;  %v497_v25 = vpop.xlane.xlu0 %496 }
 0x193   : > { %v1467_v56 = vmul.f32 0.0078125, %v499_v24  ;;  %v1473_v1 = vmul.f32 0.0078125, %v497_v25  ;;  %v635_v24 = vsub.f32 %v1360_v44, %v1461_v35  ;;  %v633_v25 = vsub.f32 %v1363_v45, %v1457_v39 }
 0x195   : > { %v605_v10 = vmul.f32 %v1467_v56, %v1467_v56  ;;  %v604_v13 = vmul.f32 %v1473_v1, %v1473_v1  ;;  %v636_v39 = vsub.f32 %v1371_v43, %v1473_v1 }
 0x196   : > { %v503_v26 = vpop.xlane.xlu1 %502  ;;  %v501_v27 = vpop.xlane.xlu0 %500 }
 0x197   : > { %v1479_v14 = vmul.f32 0.0078125, %v503_v26  ;;  %v1481_v15 = vmul.f32 0.0078125, %v501_v27 }
 0x19a   : > { %v507_v28 = vpop.xlane.xlu1 %506  ;;  %v505_v29 = vpop.xlane.xlu0 %504 }
 0x19b   : > { %v1491_v26 = vmul.f32 0.0078125, %v507_v28  ;;  %v637_v28 = vsub.f32 %v1368_v42, %v1467_v56 }
 0x19e   : > { %v1443_v30 = vpop.xlane.xlu1 %510  ;;  %v1445_v31 = vpop.xlane.xlu0 %508 }
 0x1a2   : > { %v1447_v32 = vpop.xlane.xlu1 %514  ;;  %v1449_v33 = vpop.xlane.xlu0 %512 }
 0x1a6   : > { %v1451_v36 = vpop.xlane.xlu1 %518  ;;  %v1453_v37 = vpop.xlane.xlu0 %516 }
 0x1aa   : > { %v539_v46 = vpop.xlane.xlu1 %538  ;;  %v537_v47 = vpop.xlane.xlu0 %536 }
 0x1ab   : > { %v585_v52 = vmul.f32 0.0078125, %v539_v46  ;;  %v584_v53 = vmul.f32 0.0078125, %v537_v47  ;;  %v607_v47 = vmul.f32 %v1479_v14, %v1479_v14 }
 0x1ad   : > { %v617_v57 = vsub.f32 %v585_v52, %v601_v49  ;;  %v616_v60 = vsub.f32 %v584_v53, %v600_v48  ;;  %v606_v48 = vmul.f32 %v1481_v15, %v1481_v15  ;;  %v1497_v49 = vmul.f32 0.0078125, %v505_v29 }
 0x1ae   : > { %v543_v4 = vpop.xlane.xlu1 %542  ;;  %v541_v5 = vpop.xlane.xlu0 %540  ;;  %v639_v53 = vsub.f32 %v1376_v50, %v1479_v14  ;;  %v609_v29 = vmul.f32 %v1491_v26, %v1491_v26 }
 0x1af   : > { %v649_v6 = vadd.f32 1e-12, %v617_v57  ;;  %v648_v7 = vadd.f32 1e-12, %v616_v60  ;;  %v587_v8 = vmul.f32 0.0078125, %v543_v4  ;;  %v586_v9 = vmul.f32 0.0078125, %v541_v5 }
 0x1b0   : > { %v1506_v57 = vmul.f32 0.0078125, %v1443_v30  ;;  %v1513_v4 = vmul.f32 0.0078125, %v1445_v31  ;;  %v1516_v5 = vmul.f32 0.0078125, %v1447_v32  ;;  %v1521_v30 = vld [vmem:[%s1686_s4] ss:$0 sm:$0xff]  ;;  %v638_v31 = vsub.f32 %v1379_v51, %v1481_v15 }
 0x1b1   : > { %965 = vrsqrt.f32 %v649_v6  ;;  %v619_v11 = vsub.f32 %v587_v8, %v603_v0  ;;  %v618_v12 = vsub.f32 %v586_v9, %v602_v61  ;;  %v608_v0 = vmul.f32 %v1497_v49, %v1497_v49 }
 0x1b2   : > { %967 = vrsqrt.f32 %v648_v7  ;;  %v547_v16 = vpop.xlane.xlu1 %546  ;;  %v545_v17 = vpop.xlane.xlu0 %544  ;;  %v611_v32 = vmul.f32 %v1506_v57, %v1506_v57  ;;  %v640_v14 = vsub.f32 %v1387_v55, %v1497_v49 }
 0x1b3   : > { %v651_v18 = vadd.f32 1e-12, %v619_v11  ;;  %v650_v19 = vadd.f32 1e-12, %v618_v12  ;;  %v589_v20 = vmul.f32 0.0078125, %v547_v16  ;;  %v588_v21 = vmul.f32 0.0078125, %v545_v17 }
 0x1b4   : > { %v1528_v16 = vmul.f32 0.0078125, %v1449_v33 }
 0x1b5   : > { %969 = vrsqrt.f32 %v651_v18  ;;  %v621_v27 = vsub.f32 %v589_v20, %v605_v10  ;;  %v620_v46 = vsub.f32 %v588_v21, %v604_v13  ;;  %v1533_v18 = vld [vmem:[%s1686_s4 + $0x1] ss:$0 sm:$0xff] }
 0x1b6   : > { %971 = vrsqrt.f32 %v650_v19  ;;  %v551_v34 = vpop.xlane.xlu1 %550  ;;  %v549_v38 = vpop.xlane.xlu0 %548 }
 0x1b7   : > { %v653_v44 = vadd.f32 1e-12, %v621_v27  ;;  %v652_v35 = vadd.f32 1e-12, %v620_v46  ;;  %v591_v52 = vmul.f32 0.0078125, %v551_v34  ;;  %v590_v45 = vmul.f32 0.0078125, %v549_v38 }
 0x1b8   : > { %v610_v27 = vmul.f32 %v1513_v4, %v1513_v4  ;;  %v613_v46 = vmul.f32 %v1516_v5, %v1516_v5 }
 0x1b9   : > { %973 = vrsqrt.f32 %v653_v44  ;;  %v623_v60 = vsub.f32 %v591_v52, %v607_v47  ;;  %v622_v61 = vsub.f32 %v590_v45, %v606_v48  ;;  %v612_v52 = vmul.f32 %v1528_v16, %v1528_v16 }
 0x1ba   : > { %975 = vrsqrt.f32 %v652_v35  ;;  %v555_v6 = vpop.xlane.xlu1 %554  ;;  %v553_v7 = vpop.xlane.xlu0 %552 }
 0x1bb   : > { %v966_v8 = vpop.eup %965  ;;  %v655_v9 = vadd.f32 1e-12, %v623_v60  ;;  %v654_v10 = vadd.f32 1e-12, %v622_v61  ;;  %v593_v11 = vmul.f32 0.0078125, %v555_v6  ;;  %v592_v12 = vmul.f32 0.0078125, %v553_v7 }
 0x1bc   : > { %v968_v13 = vpop.eup %967  ;;  %v681_v17 = vmul.f32 %v966_v8, %v633_v25  ;;  %v1549_v7 = vmul.f32 0.0078125, %v1451_v36 }
 0x1bd   : > { %v680_v19 = vmul.f32 %v968_v13, %v632_v23  ;;  %977 = vrsqrt.f32 %v655_v9  ;;  %v625_v20 = vsub.f32 %v593_v11, %v609_v29  ;;  %v624_v21 = vsub.f32 %v592_v12, %v608_v0 }
 0x1be   : > { %v702_v47 = vmul.f32 %v1521_v30, %v681_v17  ;;  %979 = vrsqrt.f32 %v654_v10  ;;  %v559_v33 = vpop.xlane.xlu1 %558  ;;  %v557_v25 = vpop.xlane.xlu0 %556 }
 0x1bf   : > { %v970_v48 = vpop.eup %969  ;;  %v701_v34 = vmul.f32 %v1521_v30, %v680_v19  ;;  %v657_v38 = vadd.f32 1e-12, %v625_v20  ;;  %v656_v23 = vadd.f32 1e-12, %v624_v21  ;;  %v595_v44 = vmul.f32 0.0078125, %v559_v33 }
 0x1c0   : > { %v972_v35 = vpop.eup %971  ;;  %v723_v45 = vadd.f32 %v1533_v18, %v702_v47  ;;  %v683_v29 = vmul.f32 %v970_v48, %v635_v24  ;;  %v594_v60 = vmul.f32 0.0078125, %v557_v25 }
 0x1c1   : > { %v722_v61 = vadd.f32 %v1533_v18, %v701_v34  ;;  %v682_v0 = vmul.f32 %v972_v35, %v634_v22  ;;  %981 = vrsqrt.f32 %v657_v38  ;;  %v627_v6 = vsub.f32 %v595_v44, %v611_v32 }
 0x1c2   : > { %739 = vst [vmem:[%s1264_s21 + $0x8] sm:$0xff] %v723_v45  ;;  %v704_v8 = vmul.f32 %v1521_v30, %v683_v29  ;;  %983 = vrsqrt.f32 %v656_v23  ;;  %v626_v9 = vsub.f32 %v594_v60, %v610_v27  ;;  %v563_v10 = vpop.xlane.xlu1 %562  ;;  %v561_v11 = vpop.xlane.xlu0 %560  ;;  %v1556_v32 = vmul.f32 0.0078125, %v1453_v37 }
 0x1c3   : > { %v974_v24 = vpop.eup %973  ;;  %738 = vst [vmem:[%s1264_s21] sm:$0xff] %v722_v61  ;;  %v703_v12 = vmul.f32 %v1521_v30, %v682_v0  ;;  %v659_v13 = vadd.f32 1e-12, %v627_v6  ;;  %v597_v41 = vmul.f32 0.0078125, %v563_v10  ;;  %v596_v40 = vmul.f32 0.0078125, %v561_v11 }
 0x1c4   : > { %v976_v22 = vpop.eup %975  ;;  %v725_v36 = vadd.f32 %v1533_v18, %v704_v8  ;;  %v685_v17 = vmul.f32 %v974_v24, %v637_v28  ;;  %v658_v19 = vadd.f32 1e-12, %v626_v9  ;;  %v615_v37 = vmul.f32 %v1549_v7, %v1549_v7 }
 0x1c5   : > { %v724_v20 = vadd.f32 %v1533_v18, %v703_v12  ;;  %v684_v21 = vmul.f32 %v976_v22, %v636_v39  ;;  %985 = vrsqrt.f32 %v659_v13  ;;  %v629_v27 = vsub.f32 %v597_v41, %v613_v46 }
 0x1c6   : > { %741 = vst [vmem:[%s1264_s21 + $0x18] sm:$0xff] %v725_v36  ;;  %v706_v47 = vmul.f32 %v1521_v30, %v685_v17  ;;  %987 = vrsqrt.f32 %v658_v19  ;;  %v628_v33 = vsub.f32 %v596_v40, %v612_v52  ;;  %v567_v25 = vpop.xlane.xlu1 %566  ;;  %v565_v42 = vpop.xlane.xlu0 %564  ;;  %v614_v46 = vmul.f32 %v1556_v32, %v1556_v32 }
 0x1c7   : > { %v978_v56 = vpop.eup %977  ;;  %740 = vst [vmem:[%s1264_s21 + $0x10] sm:$0xff] %v724_v20  ;;  %v705_v28 = vmul.f32 %v1521_v30, %v684_v21  ;;  %v661_v48 = vadd.f32 1e-12, %v629_v27  ;;  %v599_v43 = vmul.f32 0.0078125, %v567_v25  ;;  %v598_v1 = vmul.f32 0.0078125, %v565_v42 }
 0x1c8   : > { %v980_v39 = vpop.eup %979  ;;  %v727_v34 = vadd.f32 %v1533_v18, %v706_v47  ;;  %v687_v38 = vmul.f32 %v978_v56, %v639_v53  ;;  %v660_v23 = vadd.f32 1e-12, %v628_v33  ;;  %v641_v45 = vsub.f32 %v1384_v54, %v1491_v26 }
 0x1c9   : > { %v726_v44 = vadd.f32 %v1533_v18, %v705_v28  ;;  %v686_v35 = vmul.f32 %v980_v39, %v638_v31  ;;  %989 = vrsqrt.f32 %v661_v48  ;;  %v631_v52 = vsub.f32 %v599_v43, %v615_v37 }
 0x1ca   : > { %743 = vst [vmem:[%s1264_s21 + $0x28] sm:$0xff] %v727_v34  ;;  %v708_v29 = vmul.f32 %v1521_v30, %v687_v38  ;;  %991 = vrsqrt.f32 %v660_v23  ;;  %v630_v60 = vsub.f32 %v598_v1, %v614_v46  ;;  %v643_v6 = vsub.f32 %v1392_v58, %v1506_v57 }
 0x1cb   : > { %v982_v50 = vpop.eup %981  ;;  %742 = vst [vmem:[%s1264_s21 + $0x20] sm:$0xff] %v726_v44  ;;  %v707_v51 = vmul.f32 %v1521_v30, %v686_v35  ;;  %v663_v15 = vadd.f32 1e-12, %v631_v52  ;;  %v642_v8 = vsub.f32 %v1395_v59, %v1513_v4  ;;  %v645_v57 = vsub.f32 %v1399_v62, %v1516_v5 }
 0x1cc   : > { %v984_v53 = vpop.eup %983  ;;  %v729_v31 = vadd.f32 %v1533_v18, %v708_v29  ;;  %v689_v61 = vmul.f32 %v982_v50, %v641_v45  ;;  %v662_v54 = vadd.f32 1e-12, %v630_v60  ;;  %v644_v59 = vsub.f32 %v1401_v63, %v1528_v16 }
 0x1cd   : > { %v728_v26 = vadd.f32 %v1533_v18, %v707_v51  ;;  %v688_v0 = vmul.f32 %v984_v53, %v640_v14  ;;  %993 = vrsqrt.f32 %v663_v15  ;;  %v647_v5 = vsub.f32 %v1405_v2, %v1549_v7 }
 0x1ce   : > { %745 = vst [vmem:[%s1264_s21 + $0x38] sm:$0xff] %v729_v31  ;;  %v710_v55 = vmul.f32 %v1521_v30, %v689_v61  ;;  %995 = vrsqrt.f32 %v662_v54  ;;  %v646_v19 = vsub.f32 %v1407_v3, %v1556_v32 }
 0x1cf   : > { %v986_v49 = vpop.eup %985  ;;  %744 = vst [vmem:[%s1264_s21 + $0x30] sm:$0xff] %v728_v26  ;;  %v709_v9 = vmul.f32 %v1521_v30, %v688_v0 }
 0x1d0   : > { %v988_v10 = vpop.eup %987  ;;  %v731_v11 = vadd.f32 %v1533_v18, %v710_v55  ;;  %v691_v24 = vmul.f32 %v986_v49, %v643_v6 }
 0x1d1   : > { %v730_v12 = vadd.f32 %v1533_v18, %v709_v9  ;;  %v690_v58 = vmul.f32 %v988_v10, %v642_v8 }
 0x1d2   : > { %747 = vst [vmem:[%s1264_s21 + $0x48] sm:$0xff] %v731_v11  ;;  %v712_v13 = vmul.f32 %v1521_v30, %v691_v24 }
 0x1d3   : > { %v990_v41 = vpop.eup %989  ;;  %746 = vst [vmem:[%s1264_s21 + $0x40] sm:$0xff] %v730_v12  ;;  %v711_v4 = vmul.f32 %v1521_v30, %v690_v58 }
 0x1d4   : > { %v992_v40 = vpop.eup %991  ;;  %v733_v22 = vadd.f32 %v1533_v18, %v712_v13  ;;  %v693_v36 = vmul.f32 %v990_v41, %v645_v57 }
 0x1d5   : > { %v732_v17 = vadd.f32 %v1533_v18, %v711_v4  ;;  %v692_v62 = vmul.f32 %v992_v40, %v644_v59 }
 0x1d6   : > { %749 = vst [vmem:[%s1264_s21 + $0x58] sm:$0xff] %v733_v22  ;;  %v714_v63 = vmul.f32 %v1521_v30, %v693_v36 }
 0x1d7   : > { %v994_v16 = vpop.eup %993  ;;  %748 = vst [vmem:[%s1264_s21 + $0x50] sm:$0xff] %v732_v17  ;;  %v713_v20 = vmul.f32 %v1521_v30, %v692_v62 }
 0x1d8   : > { %v996_v21 = vpop.eup %995  ;;  %v735_v27 = vadd.f32 %v1533_v18, %v714_v63  ;;  %v695_v37 = vmul.f32 %v994_v16, %v647_v5 }
 0x1d9   : > { %v734_v2 = vadd.f32 %v1533_v18, %v713_v20  ;;  %v694_v7 = vmul.f32 %v996_v21, %v646_v19 }
 0x1da   : > { %751 = vst [vmem:[%s1264_s21 + $0x68] sm:$0xff] %v735_v27  ;;  %v716_v47 = vmul.f32 %v1521_v30, %v695_v37 }
 0x1db   : > { %750 = vst [vmem:[%s1264_s21 + $0x60] sm:$0xff] %v734_v2  ;;  %v715_v3 = vmul.f32 %v1521_v30, %v694_v7 }
 0x1dc   : > { %v737_v32 = vadd.f32 %v1533_v18, %v716_v47 }
 0x1dd   : > { %v736_v33 = vadd.f32 %v1533_v18, %v715_v3 }
 0x1de   : > { %753 = vst [vmem:[%s1264_s21 + $0x78] sm:$0xff] %v737_v32 }
 0x1df   : > { %752 = vst [vmem:[%s1264_s21 + $0x70] sm:$0xff] %v736_v33 }
 0x1e0   : > { %1050 = shalt.err (!%p1047_p2)
}
 0x1e1   : > { %s1051_s14 = scalar_lea.hbm %s1632_s9, 2048  ;;  %s1055_s19 = scalar_lea.hbm %s1688_s6, 8192 }
 0x1e2   : > { %p1052_p4 = scmp.ne.s32.totalorder %s1632_s9, %s1051_s14  ;;  %p1056_p10 = scmp.lt.u32.totalorder %s1632_s9, %s1688_s6 }
 0x1e3   : > { %p1057_p11 = scmp.lt.u32.totalorder %s1055_s19, %s1051_s14  ;;  %p1059_p1 = scmp.lt.u32.totalorder %s1051_s14, %s1632_s9 }
 0x1e4   : > { %p1053_p6 = pnand %p1052_p4, %p1699_p3 }
 0x1e5   : > { %p1058_p0 = por %p1057_p11, %p1056_p10 }
 0x1e6   : > { %p1054_p5 = pneg %p1053_p6 }
 0x1e7   : > { %p1060_p7 = por %p1059_p1, %p1058_p0 }
 0x1e9   : > { %p1061_p8 = pnand %p1060_p7, %p1054_p5 }
 0x1eb   : > { %1064 = shalt.err (!%p1061_p8)
}
 0x1ec   : > { %s1131_s23 = smov 128   ;;  %s1132_s24 = smov 8  }
 0x1ed   : > { %895 = dma.vmem_to_hbm [thread:$0]  (%p1699_p3), %s1634_s25, 2048, %s1632_s9, %s1641_s29, %s1131_s23, %s1131_s23, %s1132_s24  }
 0x1ee PF: > { %p907_p9 = scmp.ge.s32.totalorder %s1115_s28, 2  ;;  %s783_s30 = sand.u32 1, %s1103_s26  }
 0x1ef   : > { %p1700_p12 = scmp.ne.s32.totalorder %s1693_s12, 0  ;;  %s784_s8 = scalar_lea.sflag [#allocation8], %s783_s30 }
 0x1f1   : > { %p902_p13 = pnand %p907_p9, %p1700_p12 }
 0x1f3   : > { %1098 = dma.done.wait (!%p902_p13), %s784_s8, 2048  }
 0x1f4   : > { %1100 = vsyncadd (!%p902_p13), %s784_s8, 4294965248  ;;  %p23_p2 = scmp.ge.s32.totalorder %s1196_s7, 6   ;;  %s1701_s26 = smov %s1107_s27 }
 0x1f5   : > { %s1702_s27 = smov %s1111_s0  ;;  %s1703_s0 = smov %s1207_s10 }
 0x1f6   : > { %s1704_s28 = smov %s1196_s7  ;;  %25 = sbr.rel (!%p23_p2) target bundleno = 19 (0x13), region = 154 }
 0x1fd   :  { %789 = vsyncpa [#allocation7], 1 }
 0x1fe   :  { %791 = vsyncpa [#allocation7 + $0x1], 1 }
 0x1ff   :  { %792 = vsyncpa [#allocation8], 1 }
 0x200   :  { %794 = vsyncpa [#allocation8 + $0x1], 1 }
 0x201   :  { %795 = vsyncmov [#allocation3] }
 0x204   :  { %s796_s28 = vpop.sfrf %795 }
 0x205   :  { %p889_p3 = scmp.ne.s32.totalorder %s796_s28, 0 }
 0x207   :  { %800 = shalt.err (%p889_p3)  }

</bundles_post_ra>
